<compile_context>
chip_gen: v6e
topology: v6e:2x2x1
jax: 0.10.0
libtpu: 0.0.40
codegen_flags: <defaults>
</compile_context>

<pallas_src>
import jax
import jax.numpy as jnp
from jax import lax
from jax.experimental import pallas as pl
from jax.experimental.pallas import tpu as pltpu


def _round_up(n, m):
    return ((n + m - 1) // m) * m


def mlp_kernel(x_ref, w1_ref, w2_ref, sp_ref, o_ref):
    # One batch tile: (TILE_B, D) -> (1, 1, TILE_B) lane-dense output row.
    x = x_ref[...]                         # (TILE_B, D) f32

    sp = sp_ref[...]                       # (4, 128) packed small params
    b1 = sp[0:1, 0:64]                     # (1, 64)
    b2 = sp[1:2, 0:32]                     # (1, 32)
    b3 = sp[2:3, 0:1]                      # (1, 1)
    w3r = sp[3:4, 0:32]                    # (1, 32)  last-layer weight as a row

    h1 = jnp.dot(x, w1_ref[...], preferred_element_type=jnp.float32) + b1
    h1 = jnp.maximum(h1, 0.0)

    h2 = jnp.dot(h1, w2_ref[...], preferred_element_type=jnp.float32) + b2
    h2 = jnp.maximum(h2, 0.0)

    # Final 32->1 layer, produced directly in lane-dense orientation:
    # (1,32) . (TILE_B,32) contracting the last dims -> (1, TILE_B).
    h3 = lax.dot_general(
        w3r, h2, (((1,), (1,)), ((), ())),
        preferred_element_type=jnp.float32) + b3

    o_ref[...] = h3.reshape(o_ref.shape).astype(o_ref.dtype)


def pack_small_params(b1, b2, b3, w3):
    """Pack b1(64), b2(32), b3(1) and the w3 row(32) into one (4,128) buffer.

    Each item sits on its own sublane row starting at lane 0, so in-kernel
    slices are cheap prefix slices.
    """
    sp = jnp.zeros((4, 128), jnp.float32)
    sp = sp.at[0, :64].set(b1.reshape(-1).astype(jnp.float32))
    sp = sp.at[1, :32].set(b2.reshape(-1).astype(jnp.float32))
    sp = sp.at[2, 0].set(b3.reshape(-1)[0].astype(jnp.float32))
    sp = sp.at[3, :32].set(w3.reshape(-1).astype(jnp.float32))
    return sp


def _pick_tile_b(B, D, requested, vmem_budget_bytes=10 * 1024 * 1024):
    """Batch tile: multiple of 8, <= round_up(B,8), working set under budget.

    The ~10 MiB budget (x double-buffered with lane padding, h1/h2 spill
    scratch, lane-dense output, resident weights) stays below the scoped-VMEM
    default on v5e (16 MiB), v6e (32 MiB) and v7x (32 MiB of 64 MiB physical),
    so no vmem_limit_bytes override is needed.
    """
    tile_b = max(8, _round_up(min(requested, _round_up(B, 8)), 8))
    lane_d = max(_round_up(D, 128), 128)            # lane padding of the x block

    def working_set(tb):
        x_bytes = tb * lane_d * 4 * 2               # x block, double-buffered
        out_bytes = 8 * tb * 4 * 2                  # (1,1,tb) block, sublane-padded
        h_bytes = tb * (128 + 128) * 4              # h1/h2 spill scratch (lane-padded)
        w_bytes = (max(D, 8) * 128 + 64 * 128 + 8 * 128) * 4 * 2
        return x_bytes + out_bytes + h_bytes + w_bytes

    while tile_b > 8 and working_set(tile_b) > vmem_budget_bytes:
        tile_b = max(8, _round_up(tile_b // 2, 8))
    return tile_b


def mlp_forward(x, params, *, tile_b=4096):
    w1, b1, w2, b2, w3, b3 = params
    B, D = x.shape

    sp = pack_small_params(b1, b2, b3, w3)

    tile_b = _pick_tile_b(B, D, tile_b)
    n_tiles = pl.cdiv(B, tile_b)        # ragged last tile handled by Pallas

    out = pl.pallas_call(
        mlp_kernel,
        # Lane-dense output slab: one (1, tile_b) row per grid step.
        out_shape=jax.ShapeDtypeStruct((n_tiles, 1, tile_b), x.dtype),
        grid_spec=pltpu.PrefetchScalarGridSpec(
            num_scalar_prefetch=0,
            grid=(n_tiles,),
            in_specs=[
                # x: one batch tile per grid step (pipelined HBM->VMEM);
                # the last block may be ragged — pad rows are garbage but
                # never feed a cross-row reduction and are sliced off below.
                pl.BlockSpec((tile_b, D), lambda i: (i, 0)),
                # weights / packed small params: constant index -> DMA'd once,
                # VMEM-resident for the whole grid
                pl.BlockSpec(w1.shape, lambda i: (0, 0)),
                pl.BlockSpec(w2.shape, lambda i: (0, 0)),
                pl.BlockSpec((4, 128), lambda i: (0, 0)),
            ],
            out_specs=pl.BlockSpec((1, 1, tile_b), lambda i: (i, 0, 0)),
        ),
        compiler_params=pltpu.CompilerParams(
            dimension_semantics=("parallel",),   # shard batch across TCs on v7x
        ),
    )(x, w1, w2, sp)

    # Flatten lane-dense (n_tiles, 1, tile_b) back to (B, 1); rows from the
    # ragged last tile beyond B are discarded here.
    return out.reshape(-1)[:B].reshape(B, 1)


def init_params(key, input_dim):
    # Deterministic init mimicking nn.Linear's uniform(-1/sqrt(fan_in), +1/sqrt(fan_in))
    def linear(key, fan_in, fan_out):
        k_w, k_b = jax.random.split(key)
        bound = 1.0 / jnp.sqrt(fan_in)
        w = jax.random.uniform(k_w, (fan_in, fan_out), jnp.float32, -bound, bound)
        b = jax.random.uniform(k_b, (1, fan_out), jnp.float32, -bound, bound)
        return w, b

    k1, k2, k3 = jax.random.split(key, 3)
    w1, b1 = linear(k1, input_dim, 64)
    w2, b2 = linear(k2, 64, 32)
    w3, b3 = linear(k3, 32, 1)
    return (w1, b1, w2, b2, w3, b3)


def mlp_ref(x, params):
    w1, b1, w2, b2, w3, b3 = params
    h = jnp.maximum(x @ w1 + b1, 0.0)
    h = jnp.maximum(h @ w2 + b2, 0.0)
    return h @ w3 + b3


if __name__ == "__main__":
    key = jax.random.PRNGKey(0)
    k_x, k_p = jax.random.split(key)

    # batch not a multiple of tile_b -> exercises the ragged last block path.
    batch, input_dim = 70, 16
    x = jax.random.normal(k_x, (batch, input_dim), jnp.float32)
    params = init_params(k_p, input_dim)

    # Small tile so the demo actually exercises a multi-step batch grid
    # (production default tile_b=4096 amortizes per-step overhead).
    out = jax.block_until_ready(mlp_forward(x, params, tile_b=16))

    ref = mlp_ref(x, params)
    assert out.shape == (batch, 1), out.shape
    assert jnp.allclose(out, ref, atol=1e-4, rtol=1e-4), "mismatch vs JAX reference"

    print("KERNEL_OK")
</pallas_src>

<mosaic_0001>
module attributes {stable_mosaic.version = 11 : i64} {
  func.func @mlp_kernel(%arg0: i32, %arg1: memref<16x16xf32, #tpu.memory_space<vmem>>, %arg2: memref<16x64xf32, #tpu.memory_space<vmem>>, %arg3: memref<64x32xf32, #tpu.memory_space<vmem>>, %arg4: memref<4x128xf32, #tpu.memory_space<vmem>>, %arg5: memref<1x1x16xf32, #tpu.memory_space<vmem>>) attributes {dimension_semantics = [#tpu.dimension_semantics<parallel>], iteration_bounds = array<i64: 5>, scalar_prefetch = 0 : i64, scratch_operands = 0 : i64, tpu.core_type = #tpu.core_type<tc>, window_params = [{transform_indices = @transform_0, window_bounds = array<i64: 16, 16>}, {pipeline_mode = #tpu.pipeline_mode<synchronous>, transform_indices = @transform_1, window_bounds = array<i64: 16, 64>}, {pipeline_mode = #tpu.pipeline_mode<synchronous>, transform_indices = @transform_2, window_bounds = array<i64: 64, 32>}, {pipeline_mode = #tpu.pipeline_mode<synchronous>, transform_indices = @transform_3, window_bounds = array<i64: 4, 128>}, {transform_indices = @transform_4, window_bounds = array<i64: 1, 1, 16>}]} {
    %c0 = arith.constant 0 : index
    %c0_0 = arith.constant 0 : index
    %0 = vector.load %arg1[%c0, %c0_0] : memref<16x16xf32, #tpu.memory_space<vmem>>, vector<16x16xf32>
    %c0_1 = arith.constant 0 : index
    %c0_2 = arith.constant 0 : index
    %1 = vector.load %arg4[%c0_1, %c0_2] : memref<4x128xf32, #tpu.memory_space<vmem>>, vector<4x128xf32>
    %2 = vector.extract_strided_slice %1 {offsets = [0, 0], sizes = [1, 64], strides = [1, 1]} : vector<4x128xf32> to vector<1x64xf32>
    %3 = vector.extract_strided_slice %1 {offsets = [1, 0], sizes = [1, 32], strides = [1, 1]} : vector<4x128xf32> to vector<1x32xf32>
    %4 = vector.extract_strided_slice %1 {offsets = [2, 0], sizes = [1, 1], strides = [1, 1]} : vector<4x128xf32> to vector<1x1xf32>
    %5 = vector.extract_strided_slice %1 {offsets = [3, 0], sizes = [1, 32], strides = [1, 1]} : vector<4x128xf32> to vector<1x32xf32>
    %c0_3 = arith.constant 0 : index
    %c0_4 = arith.constant 0 : index
    %6 = vector.load %arg2[%c0_3, %c0_4] : memref<16x64xf32, #tpu.memory_space<vmem>>, vector<16x64xf32>
    %cst = arith.constant dense<0.000000e+00> : vector<16x64xf32>
    %7 = tpu.matmul %0, %6, %cst {dimension_numbers = #tpu.dot_dimension_numbers<[1], [0], [0], [1], [0, 0, 1, 1], [], []>} : vector<16x16xf32>, vector<16x64xf32>, vector<16x64xf32> -> vector<16x64xf32>
    %8 = vector.broadcast %2 : vector<1x64xf32> to vector<16x64xf32>
    %9 = arith.addf %7, %8 : vector<16x64xf32>
    %cst_5 = arith.constant 0.000000e+00 : f32
    %10 = vector.broadcast %cst_5 : f32 to vector<16x64xf32>
    %11 = arith.maximumf %9, %10 : vector<16x64xf32>
    %c0_6 = arith.constant 0 : index
    %c0_7 = arith.constant 0 : index
    %12 = vector.load %arg3[%c0_6, %c0_7] : memref<64x32xf32, #tpu.memory_space<vmem>>, vector<64x32xf32>
    %cst_8 = arith.constant dense<0.000000e+00> : vector<16x32xf32>
    %13 = tpu.matmul %11, %12, %cst_8 {dimension_numbers = #tpu.dot_dimension_numbers<[1], [0], [0], [1], [0, 0, 1, 1], [], []>} : vector<16x64xf32>, vector<64x32xf32>, vector<16x32xf32> -> vector<16x32xf32>
    %14 = vector.broadcast %3 : vector<1x32xf32> to vector<16x32xf32>
    %15 = arith.addf %13, %14 : vector<16x32xf32>
    %cst_9 = arith.constant 0.000000e+00 : f32
    %16 = vector.broadcast %cst_9 : f32 to vector<16x32xf32>
    %17 = arith.maximumf %15, %16 : vector<16x32xf32>
    %cst_10 = arith.constant dense<0.000000e+00> : vector<1x16xf32>
    %18 = tpu.matmul %5, %17, %cst_10 {dimension_numbers = #tpu.dot_dimension_numbers<[1], [1], [0], [0], [0, 0, 1, 0], [], []>} : vector<1x32xf32>, vector<16x32xf32>, vector<1x16xf32> -> vector<1x16xf32>
    %19 = vector.broadcast %4 : vector<1x1xf32> to vector<1x16xf32>
    %20 = arith.addf %18, %19 : vector<1x16xf32>
    %21 = vector.shape_cast %20 : vector<1x16xf32> to vector<1x1x16xf32>
    %c0_11 = arith.constant 0 : index
    %c0_12 = arith.constant 0 : index
    %c0_13 = arith.constant 0 : index
    %22 = vector.load %arg5[%c0_11, %c0_12, %c0_13] : memref<1x1x16xf32, #tpu.memory_space<vmem>>, vector<1x1x16xf32>
    tpu.vector_store %arg5[%c0_11, %c0_12, %c0_13], %21 {strides = array<i32>} : memref<1x1x16xf32, #tpu.memory_space<vmem>>, vector<1x1x16xf32>,
    return
  }
  func.func @transform_0(%arg0: i32) -> (i32, i32) {
    %c0_i32 = arith.constant 0 : i32
    %c0_i32_0 = arith.constant 0 : i32
    return %arg0, %c0_i32 : i32, i32
  }
  func.func @transform_1(%arg0: i32) -> (i32, i32) {
    %c0_i32 = arith.constant 0 : i32
    %c0_i32_0 = arith.constant 0 : i32
    %c0_i32_1 = arith.constant 0 : i32
    return %c0_i32, %c0_i32_0 : i32, i32
  }
  func.func @transform_2(%arg0: i32) -> (i32, i32) {
    %c0_i32 = arith.constant 0 : i32
    %c0_i32_0 = arith.constant 0 : i32
    %c0_i32_1 = arith.constant 0 : i32
    return %c0_i32, %c0_i32_0 : i32, i32
  }
  func.func @transform_3(%arg0: i32) -> (i32, i32) {
    %c0_i32 = arith.constant 0 : i32
    %c0_i32_0 = arith.constant 0 : i32
    %c0_i32_1 = arith.constant 0 : i32
    return %c0_i32, %c0_i32_0 : i32, i32
  }
  func.func @transform_4(%arg0: i32) -> (i32, i32, i32) {
    %c0_i32 = arith.constant 0 : i32
    %c0_i32_0 = arith.constant 0 : i32
    %c0_i32_1 = arith.constant 0 : i32
    return %arg0, %c0_i32, %c0_i32_0 : i32, i32, i32
  }
}

</mosaic_0001>

<bundles_post_ra>
// kernel: tpu_custom_call.1
= control target key start
LH: loop header
LB: loop body
LE: loop exit
PB: predicated region body
PF: predicated region fallthrough
CT: control target
= control target key end

     0   :  { %9 = vsyncpa [#allocation3], 0  ;;  %s887_s0 = inlined_call_operand.vmem [shape: f32[70,16], index: 0, kind: input, shape index: {}]   ;;  %s888_s1 = inlined_call_operand.vmem [shape: f32[16,64], index: 1, kind: input, shape index: {}]   ;;  %s889_s2 = inlined_call_operand.vmem [shape: f32[64,32], index: 2, kind: input, shape index: {}]   ;;  %s890_s3 = inlined_call_operand.vmem [shape: f32[4,128], index: 3, kind: input, shape index: {}]   ;;  %s891_s4 = inlined_call_operand.hbm [shape: f32[5,1,16], index: 4, kind: output, shape index: {}]  }
   0x1   :  { %11 = vsyncpa [#allocation3 + $0x1], 0  ;;  %s762_s15 = smov 0   ;;  %s764_s16 = smov 0  }
   0x2   :  { %s766_s17 = smov 0   ;;  %s768_s18 = smov 0  }
   0x3 LB: > { %s783_s19 = sadd.s32 4294967295, %s731_s18   ;;  %s562_s20 = sadd.s32 4294967294, %s731_s18   ;;  %s731_s18 = sphi %s768_s18, %s897_s18   ;;  %s727_s17 = sphi %s766_s17, %s896_s17   ;;  %s723_s16 = sphi %s764_s16, %s895_s16   ;;  %s719_s15 = sphi %s762_s15, %s894_s15  }
   0x4   : > { %s787_s21 = sadd.s32 1, %s731_s18   ;;  %s113_s22 = sadd.s32 1, %s727_s17 }
   0x5   : > { %s110_s23 = ssub.s32 %s731_s18, %s787_s21  ;;  %p123_p0 = scmp.ne.s32.totalorder %s727_s17, %s723_s16 }
   0x6   : > { %p111_p1 = scmp.eq.s32.totalorder %s110_s23, 0  ;;  %p124_p2 = scmp.eq.s32.totalorder %s783_s19, 4 }
   0x7   : > { %p129_p3 = scmp.ne.s32.totalorder %s723_s16, %s719_s15  ;;  %p130_p4 = scmp.eq.s32.totalorder %s562_s20, 4 }
   0x8   : > { %s798_s24 = scalar_select %p111_p1, %s727_s17, %s113_s22  }
   0x9   : > { %p800_p5 = por %p124_p2, %p123_p0  ;;  %p804_p6 = por %p130_p4, %p129_p3 }
   0xa   : > { %p565_p7 = scmp.ge.s32.totalorder %s731_s18, 1  ;;  %p174_p8 = scmp.lt.s32.totalorder %s731_s18, 6 }
   0xc   : > { %p175_p9 = pnand %p565_p7, %p174_p8 }
   0xd   : > { %s566_s5 = sshll.u32 (!%p175_p9), %s783_s19, 1  ;;  %s201_s11 = sand.u32 (!%p175_p9), 1, %s723_s16  }
   0xe   : > { %178 = sbr.rel (%p175_p9) target bundleno = 637 (0x27d), region = 36  ;;  %p208_p10 = scmp.lt.s32.totalorder (!%p175_p9), %s566_s5, 8 }
   0xf   : > { %s575_s12 = sshll.u32 (!%p175_p9), %s783_s19, 4  ;;  %s202_s13 = scalar_lea.vmem (!%p175_p9), [#allocation2], %s201_s11 }
  0x10   : > { %s495_s27 = scalar_lea.sflag (!%p175_p9), [#allocation3], %s201_s11  ;;  %s736_s19 = smov (!%p175_p9), [#allocation2]  }
  0x11   : > { %s675_s29 = sshll.u32 (!%p175_p9), %s736_s19, 4  ;;  %s676_s29 = int_to_ptr.vmem [resolvable:$false] %s675_s29 }
  0x12   : > { %s677_s30 = scalar_lea.vmem (!%p175_p9), %s676_s29, 32 }
  0x13   : > { %v221_v0 = vld [vmem:[%s888_s1 + $0x8] sm:$0xff]  ;;  %v220_v1 = vld [vmem:[%s888_s1] sm:$0xff]  ;;  %v317_v2 = vld [vmem:[%s889_s2 + $0x38] sm:$0xff]  ;;  %s899_s5 = smov (!%p208_p10, %s566_s5), 8  ;;  %vm226_vm0 = vcmask 130048   ;;  %v222_v12 = vlaneseq  ;;  %vm322_vm1 = vcmask 523264  }
  0x14   : > { %595 = vmatprep.subr.mxu0 %v221_v0  ;;  %602 = vmatprep.subr.mxu1 %v317_v2  ;;  %v316_v3 = vld [vmem:[%s889_s2 + $0x30] sm:$0xff]  ;;  %v315_v4 = vld [vmem:[%s889_s2 + $0x28] sm:$0xff]  ;;  %v314_v5 = vld [vmem:[%s889_s2 + $0x20] sm:$0xff]  ;;  %s567_s14 = sshll.u32 %s899_s5, 3  ;;  %v733_v23 = vmov 0.0   ;;  %vm734_vm2 = vmmov 0  }
  0x15   : > { %596 = vmatpush3.msra.mxu0 %v221_v0  ;;  %603 = vmatpush3.msra.mxu1 %v317_v2  ;;  %s211_s23 = scalar_lea.vmem %s887_s0, %s567_s14  ;;  %v313_v8 = vld [vmem:[%s889_s2 + $0x18] sm:$0xff]  ;;  %v312_v9 = vld [vmem:[%s889_s2 + $0x10] sm:$0xff]  ;;  %v311_v10 = vld [vmem:[%s889_s2 + $0x8] sm:$0xff]  ;;  %v223_v13 = vshrl.u32 %v222_v12, 7  ;;  %v735_v24 = vmov 0   ;;  %vm413_vm3 = vcmask 261120  }
  0x16   : > { %597 = vmatprep.subr.mxu0 %v220_v1  ;;  %604 = vmatprep.subr.mxu1 %v316_v3  ;;  %v217_v6 = vld [vmem:[%s211_s23] sm:$0xff]  ;;  %v218_v7 = vld [vmem:[%s211_s23 + $0x8] sm:$0xff]  ;;  %s507_s14 = sshll.u32 %s202_s13, 4  ;;  %vm492_vm4 = vcmask 122880   ;;  %s852_s23 = scalar_lea.hbm %s891_s4, %s575_s12  ;;  %s508_s14 = int_to_ptr.vmem [resolvable:$true] %s507_s14 }
  0x17   : > { %598 = vmatpush3.msra.mxu0 %v220_v1  ;;  %605 = vmatpush3.msra.mxu1 %v316_v3  ;;  %v310_v11 = vld [vmem:[%s889_s2] sm:$0xff]  ;;  %v224_v14 = vsub.s32 0, %v223_v13  ;;  %v320_v25 = vsub.s32 1, %v223_v13  ;;  %s671_s28 = scalar_lea.vmem %s508_s14, 16  ;;  %p678_p0 = scmp.lt.s32.totalorder %s508_s14, %s676_s29 }
  0x18   : > { %606 = vmatprep.subr.mxu1 %v315_v4  ;;  %599 = vmatprep.mubr.msk.f32.mxu0 %vm226_vm0, %v217_v6  ;;  %v219_v15 = vld [vmem:[%s890_s3] sm:$0xf]  ;;  %p672_p11 = scmp.ne.s32.totalorder %s508_s14, %s671_s28  ;;  %p679_p1 = scmp.lt.s32.totalorder %s677_s30, %s671_s28 }
  0x19   : > { %607 = vmatpush3.msra.mxu1 %v315_v4  ;;  %600 = vmatmul.mubr.msk.f32.vlgmr.msra.gmra.mxu0 %vm226_vm0, %v218_v7  ;;  %v225_v16 = vrot.slane %v219_v15, %v224_v14  ;;  %v321_v26 = vrot.slane %v219_v15, %v320_v25  ;;  %v410_v33 = vrot.slane %v219_v15, 3 }
  0x1a   : > { %608 = vmatprep.subr.mxu1 %v314_v5  ;;  %621 = vmatprep.subr.mxu0 %v733_v23  ;;  %p673_p12 = pnand %p672_p11, %p800_p5  ;;  %p680_p2 = por %p679_p1, %p678_p0 }
  0x1b   : > { %609 = vmatpush3.msra.mxu1 %v314_v5  ;;  %625 = vmatprep.mubr.msk.f32.mxu0 %vm734_vm2, %v733_v23 }
  0x1c   : > { %610 = vmatprep.subr.mxu1 %v313_v8  ;;  %670 = vset.pattern.permute.xlu0 %v735_v24  ;;  %p674_p13 = pneg %p673_p12 }
  0x1d   : > { %611 = vmatpush3.msra.mxu1 %v313_v8  ;;  %408 = vperm.xlu0 %670, %v219_v15  }
  0x1e   : > { %612 = vmatprep.subr.mxu1 %v312_v9  ;;  %p681_p3 = pnand %p680_p2, %p674_p13 }
  0x1f   : > { %613 = vmatpush3.msra.mxu1 %v312_v9 }
  0x20   : > { %614 = vmatprep.subr.mxu1 %v311_v10 }
  0x21   : > { %615 = vmatpush3.msra.mxu1 %v311_v10 }
  0x22   : > { %616 = vmatprep.subr.mxu1 %v310_v11 }
  0x23   : > { %617 = vmatpush3.msra.mxu1 %v310_v11 }
  0x98   : > { %v409_v34 = vpop.permute.xlu0 %408 }
  0x99   : > { %v411_v35 = vrot.slane %v409_v34, 2 }
  0xd9   : > { %v601_v17 = vpop.f32.mrf.mxu0 }
  0xda   : > { %v305_v18 = vadd.f32 %v601_v17, %v225_v16 }
  0xdb   : > { %v299_v19 = vpop.f32.mrf.mxu0 }
  0xdc   : > { %v300_v20 = vadd.f32 %v299_v19, %v225_v16  ;;  %v309_v22 = vmax.f32 %v305_v18, 0.0 }
  0xde   : > { %v308_v21 = vmax.f32 %v300_v20, 0.0 }
  0xe0   : > { %618 = vmatprep.mubr.msk.f32.mxu1 %vm322_vm1, %v308_v21 }
  0xe1   : > { %619 = vmatmul.mubr.msk.f32.vlgmr.msra.gmra.mxu1 %vm322_vm1, %v309_v22 }
 0x1a1   : > { %v620_v27 = vpop.f32.mrf.mxu1 }
 0x1a2   : > { %v401_v28 = vadd.f32 %v620_v27, %v321_v26 }
 0x1a3   : > { %v395_v29 = vpop.f32.mrf.mxu1 }
 0x1a4   : > { %v405_v30 = vmax.f32 %v401_v28, 0.0  ;;  %v396_v31 = vadd.f32 %v395_v29, %v321_v26 }
 0x1a6   : > { %622 = vmatpush3.xpose.msk.msra.mxu0 %vm413_vm3, %v405_v30  ;;  %v404_v32 = vmax.f32 %v396_v31, 0.0 }
 0x1a7   : > { %623 = vmatprep.subr.mxu0 %v733_v23 }
 0x1aa   : > { %624 = vmatpush3.xpose.msk.msra.mxu0 %vm413_vm3, %v404_v32 }
 0x1ad   : > { %626 = vmatmul.mubr.msk.f32.vlgmr.msra.gmra.mxu0 %vm413_vm3, %v410_v33 }
 0x26d   : > { %v488_v36 = vpop.f32.mrf.mxu0 }
 0x26e   : > { %v489_v37 = vadd.f32 %v488_v36, %v411_v35 }
 0x26f   : > { %v627_v38 = vpop.f32.mrf.mxu0 }
 0x270   : > { %493 = vst.msk [vmem:[%s202_s13] sm:$0x1] %vm492_vm4, %v489_v37 }
 0x271   : > { %684 = shalt.err (!%p681_p3)
}
 0x272   : > { %s685_s5 = scalar_lea.hbm %s852_s23, 16  ;;  %s689_s8 = scalar_lea.hbm %s891_s4, 80 }
 0x273   : > { %p686_p4 = scmp.ne.s32.totalorder %s852_s23, %s685_s5  ;;  %p690_p9 = scmp.lt.s32.totalorder %s852_s23, %s891_s4 }
 0x274   : > { %p691_p10 = scmp.lt.s32.totalorder %s689_s8, %s685_s5 }
 0x275   : > { %p687_p7 = pnand %p686_p4, %p800_p5 }
 0x276   : > { %p692_p11 = por %p691_p10, %p690_p9 }
 0x277   : > { %p688_p8 = pneg %p687_p7 }
 0x279   : > { %p693_p12 = pnand %p692_p11, %p688_p8 }
 0x27b   : > { %696 = shalt.err (!%p693_p12)
}
 0x27c   : > { %628 = dma.vmem_to_hbm [thread:$0]  (%p800_p5), %s508_s14, 16, %s852_s23, %s495_s27  }
 0x27d PF: > { %p634_p13 = scmp.ge.s32.totalorder %s731_s18, 2  ;;  %s519_s11 = sand.u32 1, %s719_s15  }
 0x27e   : > { %s520_s12 = scalar_lea.sflag [#allocation3], %s519_s11 }
 0x27f   : > { %p631_p0 = pnand %p634_p13, %p804_p6 }
 0x281   : > { %p632_p1 = pneg %p631_p0 }
 0x283   : > { %714 = dma.done.wait (%p632_p1), %s520_s12, 16  }
 0x284   : > { %716 = vsyncadd (%p632_p1), %s520_s12, 4294967280  ;;  %p14_p2 = scmp.ge.s32.totalorder %s787_s21, 7   ;;  %s894_s15 = smov %s723_s16 }
 0x285   : > { %s895_s16 = smov %s727_s17  ;;  %s896_s17 = smov %s798_s24 }
 0x286   : > { %s897_s18 = smov %s787_s21  ;;  %16 = sbr.rel (!%p14_p2) target bundleno = 3 (0x3), region = 71 }
 0x28b   :  { %524 = vsyncpa [#allocation3], 1 }
 0x28c   :  { %526 = vsyncpa [#allocation3 + $0x1], 1 }

</bundles_post_ra>
